<compile_context>
chip_gen: v5e
topology: v5e:2x2
jax: 0.10.0
libtpu: 0.0.40
codegen_flags: <defaults>
</compile_context>

<pallas_src>
import jax
import jax.numpy as jnp
from jax.experimental import pallas as pl
from jax.experimental.pallas import tpu as pltpu

_LANE = 1024            # lane-dense output: multiple of 128
_MAX_BLOCK_ROWS = 512   # 512 x 1024 f32 = 2 MiB per array per block


def _eltwisesum2_kernel(x1_ref, x2_ref, o_ref):
    # Straight VPU add on the whole VMEM tile.
    o_ref[...] = x1_ref[...] + x2_ref[...]


def eltwisesum2(x1, x2):
    """Elementwise sum x1 + x2 for arbitrary (matching) shapes."""
    assert x1.shape == x2.shape, "eltwisesum2 requires matching shapes"
    out_dtype = jnp.result_type(x1.dtype, x2.dtype)
    orig_shape = x1.shape
    n = x1.size

    # Flatten to a lane-dense 2-D slab (rows, _LANE), padding the tail.
    rows = max(1, -(-n // _LANE))
    if rows <= _MAX_BLOCK_ROWS:
        # Single block: block shape equals full array dims (always legal).
        block_rows = rows
    else:
        block_rows = _MAX_BLOCK_ROWS                  # multiple of 8
        rows = -(-rows // block_rows) * block_rows    # round rows up to block multiple

    padded_n = rows * _LANE

    def _prep(x):
        x = x.reshape(-1).astype(out_dtype)
        if padded_n != n:
            x = jnp.pad(x, (0, padded_n - n))
        return x.reshape(rows, _LANE)

    x1p = _prep(x1)
    x2p = _prep(x2)

    grid = (rows // block_rows,)
    spec = pl.BlockSpec((block_rows, _LANE), lambda i: (i, 0))

    out = pl.pallas_call(
        _eltwisesum2_kernel,
        out_shape=jax.ShapeDtypeStruct((rows, _LANE), out_dtype),
        grid=grid,
        in_specs=[spec, spec],
        out_specs=spec,
        compiler_params=pltpu.CompilerParams(
            # Every grid step is independent -> megacore sharding on v7x.
            dimension_semantics=("parallel",),
        ),
    )(x1p, x2p)

    return out.reshape(-1)[:n].reshape(orig_shape)


if __name__ == "__main__":
    # Deterministic small inputs consistent with an elementwise-sum module.
    key = jax.random.PRNGKey(0)
    k1, k2 = jax.random.split(key)
    shape = (2, 4, 16, 16)
    x1 = jax.random.normal(k1, shape, dtype=jnp.float32)
    x2 = jax.random.normal(k2, shape, dtype=jnp.float32)

    y = eltwisesum2(x1, x2)
    y = jax.block_until_ready(y)

    # Pure-JAX reference check.
    y_ref = x1 + x2
    assert y.shape == shape
    assert jnp.allclose(y, y_ref, atol=1e-6, rtol=1e-6), "mismatch vs reference"

    print("KERNEL_OK")
</pallas_src>

<mosaic_0001>
module attributes {stable_mosaic.version = 11 : i64} {
  func.func @_eltwisesum2_kernel(%arg0: i32, %arg1: memref<2x1024xf32, #tpu.memory_space<vmem>>, %arg2: memref<2x1024xf32, #tpu.memory_space<vmem>>, %arg3: memref<2x1024xf32, #tpu.memory_space<vmem>>) attributes {dimension_semantics = [#tpu.dimension_semantics<parallel>], iteration_bounds = array<i64: 1>, scalar_prefetch = 0 : i64, scratch_operands = 0 : i64, tpu.core_type = #tpu.core_type<tc>, window_params = [{transform_indices = @transform_0, window_bounds = array<i64: 2, 1024>}, {transform_indices = @transform_1, window_bounds = array<i64: 2, 1024>}, {transform_indices = @transform_2, window_bounds = array<i64: 2, 1024>}]} {
    %c0 = arith.constant 0 : index
    %c0_0 = arith.constant 0 : index
    %0 = vector.load %arg1[%c0, %c0_0] : memref<2x1024xf32, #tpu.memory_space<vmem>>, vector<2x1024xf32>
    %c0_1 = arith.constant 0 : index
    %c0_2 = arith.constant 0 : index
    %1 = vector.load %arg2[%c0_1, %c0_2] : memref<2x1024xf32, #tpu.memory_space<vmem>>, vector<2x1024xf32>
    %2 = arith.addf %0, %1 : vector<2x1024xf32>
    %c0_3 = arith.constant 0 : index
    %c0_4 = arith.constant 0 : index
    %3 = vector.load %arg3[%c0_3, %c0_4] : memref<2x1024xf32, #tpu.memory_space<vmem>>, vector<2x1024xf32>
    tpu.vector_store %arg3[%c0_3, %c0_4], %2 {strides = array<i32>} : memref<2x1024xf32, #tpu.memory_space<vmem>>, vector<2x1024xf32>,
    return
  }
  func.func @transform_0(%arg0: i32) -> (i32, i32) {
    %c0_i32 = arith.constant 0 : i32
    %c0_i32_0 = arith.constant 0 : i32
    return %arg0, %c0_i32 : i32, i32
  }
  func.func @transform_1(%arg0: i32) -> (i32, i32) {
    %c0_i32 = arith.constant 0 : i32
    %c0_i32_0 = arith.constant 0 : i32
    return %arg0, %c0_i32 : i32, i32
  }
  func.func @transform_2(%arg0: i32) -> (i32, i32) {
    %c0_i32 = arith.constant 0 : i32
    %c0_i32_0 = arith.constant 0 : i32
    return %arg0, %c0_i32 : i32, i32
  }
}

</mosaic_0001>

<bundles_post_ra>
// kernel: tpu_custom_call.1
= control target key start
LH: loop header
LB: loop body
LE: loop exit
PB: predicated region body
PF: predicated region fallthrough
CT: control target
= control target key end

     0   :  { %7 = vsyncpa [#allocation3], 0  ;;  %s174_s0 = inlined_call_operand.hbm [shape: f32[2,1024], index: 0, kind: input, shape index: {}]   ;;  %s175_s1 = inlined_call_operand.hbm [shape: f32[2,1024], index: 1, kind: input, shape index: {}]   ;;  %s176_s2 = inlined_call_operand.hbm [shape: f32[2,1024], index: 2, kind: output, shape index: {}]  }
   0x1   :  { %8 = vsyncpa [#allocation6], 0 }
   0x2   :  { %9 = vsyncpa [#allocation4], 0  ;;  %s15_s11 = sshll.u32 %s174_s0, 4  ;;  %s147_s12 = smov [#allocation2]   ;;  %s16_s11 = int_to_ptr.hbm [resolvable:$true] %s15_s11 }
   0x3   :  { %s17_s13 = sshll.u32 %s147_s12, 4  ;;  %s26_s16 = sshll.u32 %s175_s1, 4  ;;  %s18_s13 = int_to_ptr.vmem [resolvable:$true] %s17_s13  ;;  %s27_s16 = int_to_ptr.hbm [resolvable:$true] %s26_s16 }
   0x4   :  { %20 = dma.hbm_to_vmem [thread:$0]  %s16_s11, 256, %s18_s13, [#allocation3]  }
   0x5   :  { %s148_s17 = smov [#allocation5]  }
   0x6   :  { %s28_s18 = sshll.u32 %s148_s17, 4  ;;  %s29_s18 = int_to_ptr.vmem [resolvable:$true] %s28_s18 }
   0x7   :  { %31 = dma.hbm_to_vmem [thread:$0]  %s27_s16, 256, %s29_s18, [#allocation6]  }
   0x8   :  { %141 = dma.done.wait [#allocation3], 256  }
   0x9   :  { %142 = vsyncadd [#allocation3], 4294967040 }
   0xa   :  { %143 = dma.done.wait [#allocation6], 256  }
   0xb   :  { %144 = vsyncadd [#allocation6], 4294967040  ;;  %s149_s19 = smov [#allocation7]   ;;  %s55_s22 = sshll.u32 %s176_s2, 4  ;;  %v40_v0 = vld [vmem:[#allocation2] sm:$0xff]  ;;  %v42_v1 = vld [vmem:[#allocation5] sm:$0xff]  ;;  %s56_s22 = int_to_ptr.hbm [resolvable:$true] %s55_s22 }
   0xc   :  { %s53_s0 = sshll.u32 %s149_s19, 4  ;;  %v41_v2 = vld [vmem:[#allocation2 + $0x8] sm:$0xff]  ;;  %v44_v3 = vadd.f32 %v42_v1, %v40_v0  ;;  %v43_v4 = vld [vmem:[#allocation5 + $0x8] sm:$0xff]  ;;  %s54_s0 = int_to_ptr.vmem [resolvable:$true] %s53_s0 }
   0xd   :  { %v45_v5 = vadd.f32 %v43_v4, %v41_v2 }
   0xe   :  { %46 = vst [vmem:[#allocation7] sm:$0xff] %v44_v3 }
   0xf   :  { %47 = vst [vmem:[#allocation7 + $0x8] sm:$0xff] %v45_v5 }
  0x10   :  { %58 = dma.vmem_to_hbm [thread:$0]  %s54_s0, 256, %s56_s22, [#allocation4]  }
  0x11   :  { %145 = dma.done.wait [#allocation4], 256  }
  0x12   :  { %146 = vsyncadd [#allocation4], 4294967040 }
  0x13   :  { %63 = vsyncpa [#allocation3], 1 }
  0x14   :  { %64 = vsyncpa [#allocation6], 1 }
  0x15   :  { %65 = vsyncpa [#allocation4], 1 }

</bundles_post_ra>
